<compile_context>
chip_gen: v5e
topology: v5e:2x2
jax: 0.10.0
libtpu: 0.0.40
codegen_flags: <defaults>
</compile_context>

<pallas_src>
import jax
import jax.numpy as jnp
from jax.experimental import pallas as pl
from jax.experimental.pallas import tpu as pltpu

LANE = 128  # TPU lane width


def _mlp_kernel(x_ref, w1_ref, b1_ref, w2_ref, b2_ref, o_ref):
    # x: (TB, K_pad) f32, w1: (K_pad, H) bf16, b1: (1, H) f32,
    # w2: (H, N_pad) bf16, b2: (1, N_pad) f32, o: (TB, N_pad) f32
    x = x_ref[...].astype(jnp.bfloat16)
    h = jnp.dot(x, w1_ref[...], preferred_element_type=jnp.float32) + b1_ref[...]
    h = jnp.maximum(h, 0.0)                       # ReLU (f32)
    # Dropout(0.3) -> identity at inference time
    y = jnp.dot(h.astype(jnp.bfloat16), w2_ref[...],
                preferred_element_type=jnp.float32) + b2_ref[...]
    o_ref[...] = y.astype(o_ref.dtype)


def _round_up(n, m):
    return ((n + m - 1) // m) * m


def audio_sentiment_forward(x, w1, b1, w2, b2, *, tb=512):
    """x: (B, input_dim) f32; w1: (in, hidden); b1: (1, hidden);
    w2: (hidden, out); b2: (1, out).  Returns (B, out) f32."""
    B, d_in = x.shape
    hidden = w1.shape[1]
    d_out = w2.shape[1]

    # ---- lane-dense padded shapes ------------------------------------------
    d_in_p = _round_up(max(d_in, LANE), LANE)     # contraction dim -> 128
    d_out_p = _round_up(max(d_out, LANE), LANE)   # output dim -> 128
    h_p = _round_up(max(hidden, LANE), LANE)

    # Batch tile: multiple of 8 (sublane), collapse for tiny batches.
    tb_eff = min(tb, _round_up(B, 8))
    B_p = _round_up(B, tb_eff)

    # ---- wrapper-side zero padding / dtype prep ----------------------------
    x_p = jnp.pad(x, ((0, B_p - B), (0, d_in_p - d_in)))
    w1_p = jnp.pad(w1, ((0, d_in_p - d_in), (0, h_p - hidden))).astype(jnp.bfloat16)
    b1_p = jnp.pad(b1, ((0, 0), (0, h_p - hidden))).astype(jnp.float32)
    w2_p = jnp.pad(w2, ((0, h_p - hidden), (0, d_out_p - d_out))).astype(jnp.bfloat16)
    b2_p = jnp.pad(b2, ((0, 0), (0, d_out_p - d_out))).astype(jnp.float32)

    grid = (B_p // tb_eff,)

    out_padded = pl.pallas_call(
        _mlp_kernel,
        out_shape=jax.ShapeDtypeStruct((B_p, d_out_p), jnp.float32),
        grid=grid,
        in_specs=[
            pl.BlockSpec((tb_eff, d_in_p), lambda i: (i, 0)),   # streamed x tile
            pl.BlockSpec((d_in_p, h_p), lambda i: (0, 0)),      # resident weights
            pl.BlockSpec((1, h_p), lambda i: (0, 0)),
            pl.BlockSpec((h_p, d_out_p), lambda i: (0, 0)),
            pl.BlockSpec((1, d_out_p), lambda i: (0, 0)),
        ],
        out_specs=pl.BlockSpec((tb_eff, d_out_p), lambda i: (i, 0)),
        compiler_params=pltpu.CompilerParams(
            dimension_semantics=("parallel",)),
    )(x_p, w1_p, b1_p, w2_p, b2_p)

    # Slice away batch + lane padding.
    return out_padded[:B, :d_out]


def init_params(key, input_dim=40, hidden_dim=128, output_dim=3):
    """Deterministic synthetic parameters (PyTorch nn.Linear-style uniform init).
    Weights stored as (in, out) == transpose of torch's (out, in) layout."""
    k1, k2, k3, k4 = jax.random.split(key, 4)
    bound1 = 1.0 / jnp.sqrt(input_dim)
    bound2 = 1.0 / jnp.sqrt(hidden_dim)
    w1 = jax.random.uniform(k1, (input_dim, hidden_dim), jnp.float32, -bound1, bound1)
    b1 = jax.random.uniform(k2, (1, hidden_dim), jnp.float32, -bound1, bound1)
    w2 = jax.random.uniform(k3, (hidden_dim, output_dim), jnp.float32, -bound2, bound2)
    b2 = jax.random.uniform(k4, (1, output_dim), jnp.float32, -bound2, bound2)
    return w1, b1, w2, b2


if __name__ == "__main__":
    input_dim, hidden_dim, output_dim = 40, 128, 3
    batch = 8

    key = jax.random.PRNGKey(0)
    kx, kp = jax.random.split(key)
    x = jax.random.normal(kx, (batch, input_dim), jnp.float32)
    w1, b1, w2, b2 = init_params(kp, input_dim, hidden_dim, output_dim)

    fwd = jax.jit(audio_sentiment_forward, static_argnames=("tb",))
    out = jax.block_until_ready(fwd(x, w1, b1, w2, b2))
    assert out.shape == (batch, output_dim)

    # Reference following the same bf16-weight / f32-accumulate path.
    x_bf, w1_bf, w2_bf = (a.astype(jnp.bfloat16) for a in (x, w1, w2))
    h_ref = jnp.maximum(
        jnp.dot(x_bf, w1_bf, preferred_element_type=jnp.float32) + b1, 0.0)
    ref_bf16 = jnp.dot(h_ref.astype(jnp.bfloat16), w2_bf,
                       preferred_element_type=jnp.float32) + b2
    assert jnp.allclose(out, ref_bf16, atol=1e-4, rtol=1e-4)

    # Loose check against the full-precision f32 reference.
    ref_f32 = jnp.maximum(x @ w1 + b1, 0.0) @ w2 + b2
    assert jnp.allclose(out, ref_f32, atol=5e-2, rtol=5e-2)

    print("KERNEL_OK")
</pallas_src>

<mosaic_0001>
module attributes {stable_mosaic.version = 11 : i64} {
  func.func @_mlp_kernel(%arg0: i32, %arg1: memref<8x128xf32, #tpu.memory_space<vmem>>, %arg2: memref<128x128xbf16, #tpu.memory_space<vmem>>, %arg3: memref<1x128xf32, #tpu.memory_space<vmem>>, %arg4: memref<128x128xbf16, #tpu.memory_space<vmem>>, %arg5: memref<1x128xf32, #tpu.memory_space<vmem>>, %arg6: memref<8x128xf32, #tpu.memory_space<vmem>>) attributes {dimension_semantics = [#tpu.dimension_semantics<parallel>], iteration_bounds = array<i64: 1>, scalar_prefetch = 0 : i64, scratch_operands = 0 : i64, tpu.core_type = #tpu.core_type<tc>, window_params = [{transform_indices = @transform_0, window_bounds = array<i64: 8, 128>}, {pipeline_mode = #tpu.pipeline_mode<synchronous>, transform_indices = @transform_1, window_bounds = array<i64: 128, 128>}, {pipeline_mode = #tpu.pipeline_mode<synchronous>, transform_indices = @transform_2, window_bounds = array<i64: 1, 128>}, {pipeline_mode = #tpu.pipeline_mode<synchronous>, transform_indices = @transform_3, window_bounds = array<i64: 128, 128>}, {pipeline_mode = #tpu.pipeline_mode<synchronous>, transform_indices = @transform_4, window_bounds = array<i64: 1, 128>}, {transform_indices = @transform_5, window_bounds = array<i64: 8, 128>}]} {
    %c0 = arith.constant 0 : index
    %c0_0 = arith.constant 0 : index
    %0 = vector.load %arg1[%c0, %c0_0] : memref<8x128xf32, #tpu.memory_space<vmem>>, vector<8x128xf32>
    %1 = arith.truncf %0 : vector<8x128xf32> to vector<8x128xbf16>
    %c0_1 = arith.constant 0 : index
    %c0_2 = arith.constant 0 : index
    %2 = vector.load %arg2[%c0_1, %c0_2] : memref<128x128xbf16, #tpu.memory_space<vmem>>, vector<128x128xbf16>
    %cst = arith.constant dense<0.000000e+00> : vector<8x128xf32>
    %3 = tpu.matmul %1, %2, %cst {dimension_numbers = #tpu.dot_dimension_numbers<[1], [0], [0], [1], [0, 0, 1, 1], [], []>} : vector<8x128xbf16>, vector<128x128xbf16>, vector<8x128xf32> -> vector<8x128xf32>
    %c0_3 = arith.constant 0 : index
    %c0_4 = arith.constant 0 : index
    %4 = vector.load %arg3[%c0_3, %c0_4] : memref<1x128xf32, #tpu.memory_space<vmem>>, vector<1x128xf32>
    %5 = vector.broadcast %4 : vector<1x128xf32> to vector<8x128xf32>
    %6 = arith.addf %3, %5 : vector<8x128xf32>
    %cst_5 = arith.constant 0.000000e+00 : f32
    %7 = vector.broadcast %cst_5 : f32 to vector<8x128xf32>
    %8 = arith.maximumf %6, %7 : vector<8x128xf32>
    %9 = arith.truncf %8 : vector<8x128xf32> to vector<8x128xbf16>
    %c0_6 = arith.constant 0 : index
    %c0_7 = arith.constant 0 : index
    %10 = vector.load %arg4[%c0_6, %c0_7] : memref<128x128xbf16, #tpu.memory_space<vmem>>, vector<128x128xbf16>
    %cst_8 = arith.constant dense<0.000000e+00> : vector<8x128xf32>
    %11 = tpu.matmul %9, %10, %cst_8 {dimension_numbers = #tpu.dot_dimension_numbers<[1], [0], [0], [1], [0, 0, 1, 1], [], []>} : vector<8x128xbf16>, vector<128x128xbf16>, vector<8x128xf32> -> vector<8x128xf32>
    %c0_9 = arith.constant 0 : index
    %c0_10 = arith.constant 0 : index
    %12 = vector.load %arg5[%c0_9, %c0_10] : memref<1x128xf32, #tpu.memory_space<vmem>>, vector<1x128xf32>
    %13 = vector.broadcast %12 : vector<1x128xf32> to vector<8x128xf32>
    %14 = arith.addf %11, %13 : vector<8x128xf32>
    %c0_11 = arith.constant 0 : index
    %c0_12 = arith.constant 0 : index
    %15 = vector.load %arg6[%c0_11, %c0_12] : memref<8x128xf32, #tpu.memory_space<vmem>>, vector<8x128xf32>
    tpu.vector_store %arg6[%c0_11, %c0_12], %14 {strides = array<i32>} : memref<8x128xf32, #tpu.memory_space<vmem>>, vector<8x128xf32>,
    return
  }
  func.func @transform_0(%arg0: i32) -> (i32, i32) {
    %c0_i32 = arith.constant 0 : i32
    %c0_i32_0 = arith.constant 0 : i32
    return %arg0, %c0_i32 : i32, i32
  }
  func.func @transform_1(%arg0: i32) -> (i32, i32) {
    %c0_i32 = arith.constant 0 : i32
    %c0_i32_0 = arith.constant 0 : i32
    %c0_i32_1 = arith.constant 0 : i32
    return %c0_i32, %c0_i32_0 : i32, i32
  }
  func.func @transform_2(%arg0: i32) -> (i32, i32) {
    %c0_i32 = arith.constant 0 : i32
    %c0_i32_0 = arith.constant 0 : i32
    %c0_i32_1 = arith.constant 0 : i32
    return %c0_i32, %c0_i32_0 : i32, i32
  }
  func.func @transform_3(%arg0: i32) -> (i32, i32) {
    %c0_i32 = arith.constant 0 : i32
    %c0_i32_0 = arith.constant 0 : i32
    %c0_i32_1 = arith.constant 0 : i32
    return %c0_i32, %c0_i32_0 : i32, i32
  }
  func.func @transform_4(%arg0: i32) -> (i32, i32) {
    %c0_i32 = arith.constant 0 : i32
    %c0_i32_0 = arith.constant 0 : i32
    %c0_i32_1 = arith.constant 0 : i32
    return %c0_i32, %c0_i32_0 : i32, i32
  }
  func.func @transform_5(%arg0: i32) -> (i32, i32) {
    %c0_i32 = arith.constant 0 : i32
    %c0_i32_0 = arith.constant 0 : i32
    return %arg0, %c0_i32 : i32, i32
  }
}

</mosaic_0001>

<bundles_post_ra>
// kernel: audio_sentiment_forward.1
= control target key start
LH: loop header
LB: loop body
LE: loop exit
PB: predicated region body
PF: predicated region fallthrough
CT: control target
= control target key end

     0   :  { %s363_s1 = inlined_call_operand.vmem [shape: bf16[128,128], index: 1, kind: input, shape index: {}]   ;;  %s364_s3 = inlined_call_operand.vmem [shape: bf16[128,128], index: 3, kind: input, shape index: {}]   ;;  %s365_s2 = inlined_call_operand.vmem [shape: f32[1,128], index: 2, kind: input, shape index: {}]   ;;  %s366_s0 = inlined_call_operand.vmem [shape: f32[8,128], index: 0, kind: input, shape index: {}]   ;;  %s367_s4 = inlined_call_operand.vmem [shape: f32[1,128], index: 4, kind: input, shape index: {}]   ;;  %s368_s5 = inlined_call_operand.vmem [shape: f32[8,128], index: 5, kind: output, shape index: {}]  }
   0x1   :  { %v262_v0 = vld [vmem:[%s363_s1 + $0x38] sm:$0xff]  ;;  %v261_v1 = vld [vmem:[%s363_s1 + $0x30] sm:$0xff]  ;;  %v260_v4 = vld [vmem:[%s363_s1 + $0x28] sm:$0xff] }
   0x2   :  { %90 = vmatpush.bf16.msra.mxu0 %v262_v0  ;;  %v270_v2 = vld [vmem:[%s364_s3 + $0x38] sm:$0xff]  ;;  %v269_v3 = vld [vmem:[%s364_s3 + $0x30] sm:$0xff]  ;;  %v268_v5 = vld [vmem:[%s364_s3 + $0x28] sm:$0xff] }
   0x3   :  { %173 = vmatpush.bf16.msra.mxu1 %v270_v2  ;;  %v259_v6 = vld [vmem:[%s363_s1 + $0x20] sm:$0xff]  ;;  %v258_v8 = vld [vmem:[%s363_s1 + $0x18] sm:$0xff]  ;;  %v257_v10 = vld [vmem:[%s363_s1 + $0x10] sm:$0xff] }
   0x4   :  { %v267_v7 = vld [vmem:[%s364_s3 + $0x20] sm:$0xff]  ;;  %v266_v9 = vld [vmem:[%s364_s3 + $0x18] sm:$0xff]  ;;  %v265_v11 = vld [vmem:[%s364_s3 + $0x10] sm:$0xff] }
   0x5   :  { %v256_v12 = vld [vmem:[%s363_s1 + $0x8] sm:$0xff]  ;;  %v255_v13 = vld [vmem:[%s363_s1] sm:$0xff] }
   0x6   :  { %91 = vmatpush.bf16.msra.mxu0 %v261_v1  ;;  %v20_v14 = vld [vmem:[%s366_s0] sm:$0xff]  ;;  %v264_v16 = vld [vmem:[%s364_s3 + $0x8] sm:$0xff] }
   0x7   :  { %174 = vmatpush.bf16.msra.mxu1 %v269_v3  ;;  %v21_v15 = vpack.c.bf16 %v20_v14, %v20_v14  ;;  %v263_v17 = vld [vmem:[%s364_s3] sm:$0xff] }
   0x8   :  { %v271_v18 = vld [vmem:[%s365_s2] ss:$0 sm:$0xff] }
   0x9   :  { %v272_v24 = vld [vmem:[%s367_s4] ss:$0 sm:$0xff] }
   0xa   :  { %92 = vmatpush.bf16.msra.mxu0 %v260_v4 }
   0xb   :  { %175 = vmatpush.bf16.msra.mxu1 %v268_v5 }
   0xe   :  { %93 = vmatpush.bf16.msra.mxu0 %v259_v6 }
   0xf   :  { %176 = vmatpush.bf16.msra.mxu1 %v267_v7 }
  0x12   :  { %94 = vmatpush.bf16.msra.mxu0 %v258_v8 }
  0x13   :  { %177 = vmatpush.bf16.msra.mxu1 %v266_v9 }
  0x16   :  { %95 = vmatpush.bf16.msra.mxu0 %v257_v10 }
  0x17   :  { %178 = vmatpush.bf16.msra.mxu1 %v265_v11 }
  0x1a   :  { %96 = vmatpush.bf16.msra.mxu0 %v256_v12 }
  0x1b   :  { %179 = vmatpush.bf16.msra.mxu1 %v264_v16 }
  0x1e   :  { %97 = vmatpush.bf16.msra.mxu0 %v255_v13 }
  0x1f   :  { %180 = vmatpush.bf16.msra.mxu1 %v263_v17 }
  0x21   :  { %98 = vmatmul.bf16.vlgmr.msra.gmra.mxu0 %v21_v15 }
  0x9e   :  { %v99_v19 = vpop.f32.mrf.mxu0 }
  0x9f   :  { %v100_v20 = vadd.f32 %v271_v18, %v99_v19 }
  0xa1   :  { %v103_v21 = vmax.f32 %v100_v20, 0.0 }
  0xa3   :  { %v104_v22 = vpack.c.bf16 %v103_v21, %v103_v21 }
  0xa5   :  { %181 = vmatmul.bf16.vlgmr.msra.gmra.mxu1 %v104_v22 }
  0xa6   :  { %v101_v23 = vpop.f32.mrf.mxu0 }
 0x122   :  { %v182_v25 = vpop.f32.mrf.mxu1 }
 0x123   :  { %v183_v26 = vadd.f32 %v272_v24, %v182_v25 }
 0x125   :  { %186 = vst [vmem:[%s368_s5] sm:$0xff] %v183_v26 }
 0x12a   :  { %v184_v27 = vpop.f32.mrf.mxu1 }

</bundles_post_ra>
